<compile_context>
chip_gen: v7x
topology: tpu7x:2x2x1
jax: 0.10.0
libtpu: 0.0.40
codegen_flags: <defaults>
</compile_context>

<pallas_src>
import jax
import jax.numpy as jnp
from jax.experimental import pallas as pl
from jax.experimental.pallas import tpu as pltpu


def _round_up(x, m):
    return ((x + m - 1) // m) * m


def attention_embedding_kernel(ids_ref, w1p_ref, tab_ref, b1_ref, w2_ref, b2_ref,
                               out_ref):
    # ids_ref : (bb*S, 1) int32   item ids for this batch tile (row-major flattened)
    # w1p_ref : (V_pad, 2A) bf16  [bf16(table@w1) | bf16(residual)]   (VMEM-resident)
    # tab_ref : (V_pad, 2E) bf16  [bf16(table)    | bf16(residual)]   (VMEM-resident)
    # b1_ref  : (1, A) f32,  w2_ref: (1, A) f32,  b2_ref: (1, 1) f32
    # out_ref : (bb, E) f32
    bb, e_dim = out_ref.shape
    n_rows = ids_ref.shape[0]                  # bb * S
    seq = n_rows // bb
    v_pad = w1p_ref.shape[0]
    a_dim = w1p_ref.shape[1] // 2

    # ---- one-hot row selector (bf16: 0/1 are exact) ----
    ids = ids_ref[...]                                                    # (bb*S, 1)
    onehot = (jax.lax.broadcasted_iota(jnp.int32, (n_rows, v_pad), 1) == ids
              ).astype(jnp.bfloat16)                                      # (bb*S, V_pad)

    # ---- attention scores: gather rows of W1p = table@w1 via ONE bf16 matmul on the
    #      hi|lo slab (exact to ~2^-17 of f32), then Tanh and the width-1 Linear ----
    g = jnp.dot(onehot, w1p_ref[...], preferred_element_type=jnp.float32)  # (bb*S, 2A)
    h = jnp.tanh(g[:, :a_dim] + g[:, a_dim:] + b1_ref[...])                # (bb*S, A)
    # second Linear has output width 1: VPU multiply + lane reduction (no N=1 matmul)
    scores = jnp.sum(h * w2_ref[...], axis=-1, keepdims=True) + b2_ref[...]  # (bb*S, 1)

    # ---- softmax over the sequence axis ----
    s3 = scores.reshape(bb, seq, 1)
    m = jnp.max(s3, axis=1, keepdims=True)
    p = jnp.exp(s3 - m)
    w3 = p / jnp.sum(p, axis=1, keepdims=True)                             # (bb, S, 1)

    # ---- pooled output = (weighted one-hot summed over S) @ table ----
    w_col = w3.reshape(n_rows, 1)                                          # (bb*S, 1)
    wsum = jnp.sum((w_col * onehot).reshape(bb, seq, v_pad), axis=1)       # (bb, V_pad) f32
    # split the mixing weights into bf16-exact hi/lo so the pooling matmul is also
    # exact under any MXU precision mode (two tiny M=bb bf16 dots).
    w_hi = wsum.astype(jnp.bfloat16)
    w_lo = (wsum - w_hi.astype(jnp.float32)).astype(jnp.bfloat16)
    pooled = (jnp.dot(w_hi, tab_ref[...], preferred_element_type=jnp.float32)
              + jnp.dot(w_lo, tab_ref[...], preferred_element_type=jnp.float32))  # (bb, 2E)
    out_ref[...] = pooled[:, :e_dim] + pooled[:, e_dim:]                   # (bb, E)


def _bf16_hi_lo_cat(x):
    """Concat [bf16(x) | bf16(x - bf16(x))] -> one (rows, 2*cols) bf16 MXU operand."""
    hi = x.astype(jnp.bfloat16)
    lo = (x - hi.astype(jnp.float32)).astype(jnp.bfloat16)
    return jnp.concatenate([hi, lo], axis=1)


def _step_vmem_bytes(bb, s, v_pad, a, e):
    """Rough per-grid-step VMEM working set (blocks + dominant intermediates)."""
    r = bb * s
    ids_b = r * 128 * 4 * 2                    # (r, 1) i32 block, lane-padded, x2 bufs
    out_b = bb * 128 * 4 * 2                   # (bb, E<=128) f32 block, x2 bufs
    onehot = r * v_pad * 2                     # bf16 one-hot
    wprod = r * v_pad * 4                      # f32 weighted one-hot (live with one-hot)
    mlp = r * 128 * 4 * 3                      # g / h / scores working set (lane-padded)
    params = (v_pad * 2 * a + v_pad * 2 * e) * 2 * 2 + 4 * 8 * 128 * 4
    return ids_b + out_b + onehot + wprod + mlp + params


def _pick_block_b(batch, s, v_pad, a, e, budget):
    # Target ~4096 flattened rows per step (amortize ~0.35us/step overhead, fill MXU M),
    # then shrink until the one-hot-dominated footprint fits the VMEM budget.
    bb = max(8, min(1024, _round_up(4096 // max(s, 1), 8)))
    bb = min(bb, _round_up(batch, 8))
    while bb > 8 and _step_vmem_bytes(bb, s, v_pad, a, e) > budget:
        bb = max(8, _round_up(bb // 2, 8))
    if batch >= 16:   # keep >= 2 grid steps so both v7x TensorCores get work
        bb = min(bb, _round_up((batch + 1) // 2, 8))
    return bb


def attention_embedding(item_ids, emb_table, w1, b1, w2, b2, *, block_b=None):
    """item_ids: (B, S) int; returns (B, E) float32 attention-pooled embeddings."""
    B, S = item_ids.shape
    V, E = emb_table.shape
    A = w1.shape[1]
    V_pad = _round_up(V, 128)          # lane-aligned contraction dim for the one-hot

    budget = 20 * 1024 * 1024          # per-step working-set budget (safe on v7x 32MiB scoped VMEM)
    if _step_vmem_bytes(8, S, V_pad, A, E) > budget:
        # TODO(synk): vocab too large for the fused one-hot gather; tile the vocab axis
        # or fall back to a pre-gathered (jnp.take) input / manual DMA row gather.
        raise ValueError("vocab too large for fused one-hot gather kernel")
    if block_b is None:
        block_b = _pick_block_b(B, S, V_pad, A, E, budget)
    block_b = max(8, _round_up(block_b, 8))

    b_pad = _round_up(B, block_b)
    ids = item_ids.astype(jnp.int32)
    if b_pad != B:
        # padded rows look up item 0; their pooled outputs are discarded below
        ids = jnp.pad(ids, ((0, b_pad - B), (0, 0)))
    ids_col = ids.reshape(b_pad * S, 1)

    # ---- wrapper-side precompute (grid-invariant, done once) ----
    table_f32 = emb_table.astype(jnp.float32)
    table_pad = jnp.pad(table_f32, ((0, V_pad - V), (0, 0)))   # zero rows never selected
    w1p = table_pad @ w1.astype(jnp.float32)                   # (V_pad, A) f32
    w1p_cat = _bf16_hi_lo_cat(w1p)                             # (V_pad, 2A) bf16
    tab_cat = _bf16_hi_lo_cat(table_pad)                       # (V_pad, 2E) bf16
    b1_row = b1.astype(jnp.float32).reshape(1, A)
    w2_row = w2.astype(jnp.float32).reshape(1, A)              # (A,1) -> lane row
    b2_scalar = b2.astype(jnp.float32).reshape(1, 1)

    step_bytes = _step_vmem_bytes(block_b, S, V_pad, A, E)
    vmem_limit = int(min(32 * 1024 * 1024,
                         max(4 * 1024 * 1024, step_bytes * 5 // 4 + (1 << 20))))

    out = pl.pallas_call(
        attention_embedding_kernel,
        out_shape=jax.ShapeDtypeStruct((b_pad, E), jnp.float32),
        grid=(b_pad // block_b,),
        in_specs=[
            pl.BlockSpec((block_b * S, 1), lambda i: (i, 0)),
            # parameters: constant block index -> fetched once, VMEM-resident all steps
            pl.BlockSpec((V_pad, 2 * A), lambda i: (0, 0)),
            pl.BlockSpec((V_pad, 2 * E), lambda i: (0, 0)),
            pl.BlockSpec((1, A), lambda i: (0, 0)),
            pl.BlockSpec((1, A), lambda i: (0, 0)),
            pl.BlockSpec((1, 1), lambda i: (0, 0)),
        ],
        out_specs=pl.BlockSpec((block_b, E), lambda i: (i, 0)),
        compiler_params=pltpu.CompilerParams(
            dimension_semantics=("parallel",),
            vmem_limit_bytes=vmem_limit,
        ),
    )(ids_col, w1p_cat, tab_cat, b1_row, w2_row, b2_scalar)
    return out[:B]


def attention_embedding_ref(item_ids, emb_table, w1, b1, w2, b2):
    """Pure-JAX reference matching the PyTorch forward exactly."""
    emb = jnp.take(emb_table, item_ids, axis=0)                # (B, S, E)
    h = jnp.tanh(emb @ w1 + b1)                                # (B, S, A)
    scores = h @ w2 + b2                                       # (B, S, 1)
    weights = jax.nn.softmax(scores, axis=1)                   # (B, S, 1)
    return jnp.sum(weights * emb, axis=1)                      # (B, E)


if __name__ == "__main__":
    # module hyperparameters
    num_items, embedding_dim, attention_dim = 50, 32, 16
    B, S = 2, 8

    key = jax.random.PRNGKey(0)
    k_ids, k_emb, k_w1, k_b1, k_w2, k_b2 = jax.random.split(key, 6)

    item_ids = jax.random.randint(k_ids, (B, S), 0, num_items, dtype=jnp.int32)
    emb_table = jax.random.normal(k_emb, (num_items, embedding_dim), jnp.float32)
    w1 = jax.random.normal(k_w1, (embedding_dim, attention_dim), jnp.float32) * 0.1
    b1 = jax.random.normal(k_b1, (attention_dim,), jnp.float32) * 0.1
    w2 = jax.random.normal(k_w2, (attention_dim, 1), jnp.float32) * 0.1
    b2 = jax.random.normal(k_b2, (1,), jnp.float32) * 0.1

    out = attention_embedding(item_ids, emb_table, w1, b1, w2, b2)
    out = jax.block_until_ready(out)

    ref = attention_embedding_ref(item_ids, emb_table, w1, b1, w2, b2)
    assert out.shape == (B, embedding_dim)
    # Gather / pooling use bf16-exact hi|lo slabs (error ~2^-17 relative); remaining
    # differences vs. the XLA reference come only from matmul pass ordering.
    assert jnp.allclose(out, ref, atol=1e-3, rtol=1e-3), "mismatch vs reference"

    print("KERNEL_OK")
</pallas_src>

<mosaic_0001>
module attributes {stable_mosaic.version = 11 : i64} {
  func.func @attention_embedding_kernel(%arg0: i32, %arg1: memref<64x1xi32, #tpu.memory_space<vmem>>, %arg2: memref<128x32xbf16, #tpu.memory_space<vmem>>, %arg3: memref<128x64xbf16, #tpu.memory_space<vmem>>, %arg4: memref<1x16xf32, #tpu.memory_space<vmem>>, %arg5: memref<1x16xf32, #tpu.memory_space<vmem>>, %arg6: memref<1x1xf32, #tpu.memory_space<vmem>>, %arg7: memref<8x32xf32, #tpu.memory_space<vmem>>) attributes {dimension_semantics = [#tpu.dimension_semantics<parallel>], iteration_bounds = array<i64: 1>, scalar_prefetch = 0 : i64, scratch_operands = 0 : i64, tpu.core_type = #tpu.core_type<tc>, window_params = [{transform_indices = @transform_0, window_bounds = array<i64: 64, 1>}, {pipeline_mode = #tpu.pipeline_mode<synchronous>, transform_indices = @transform_1, window_bounds = array<i64: 128, 32>}, {pipeline_mode = #tpu.pipeline_mode<synchronous>, transform_indices = @transform_2, window_bounds = array<i64: 128, 64>}, {pipeline_mode = #tpu.pipeline_mode<synchronous>, transform_indices = @transform_3, window_bounds = array<i64: 1, 16>}, {pipeline_mode = #tpu.pipeline_mode<synchronous>, transform_indices = @transform_4, window_bounds = array<i64: 1, 16>}, {pipeline_mode = #tpu.pipeline_mode<synchronous>, transform_indices = @transform_5, window_bounds = array<i64: 1, 1>}, {transform_indices = @transform_6, window_bounds = array<i64: 8, 32>}]} {
    %c0 = arith.constant 0 : index
    %c0_0 = arith.constant 0 : index
    %0 = vector.load %arg1[%c0, %c0_0] : memref<64x1xi32, #tpu.memory_space<vmem>>, vector<64x1xi32>
    %1 = tpu.iota {dimensions = array<i32: 1>} : vector<64x128xi32>
    %2 = vector.broadcast %0 : vector<64x1xi32> to vector<64x128xi32>
    %3 = arith.cmpi eq, %1, %2 : vector<64x128xi32>
    %4 = arith.extui %3 : vector<64x128xi1> to vector<64x128xi32>
    %5 = arith.sitofp %4 : vector<64x128xi32> to vector<64x128xf32>
    %6 = arith.truncf %5 : vector<64x128xf32> to vector<64x128xbf16>
    %c0_1 = arith.constant 0 : index
    %c0_2 = arith.constant 0 : index
    %7 = vector.load %arg2[%c0_1, %c0_2] : memref<128x32xbf16, #tpu.memory_space<vmem>>, vector<128x32xbf16>
    %cst = arith.constant dense<0.000000e+00> : vector<64x32xf32>
    %8 = tpu.matmul %6, %7, %cst {dimension_numbers = #tpu.dot_dimension_numbers<[1], [0], [0], [1], [0, 0, 1, 1], [], []>} : vector<64x128xbf16>, vector<128x32xbf16>, vector<64x32xf32> -> vector<64x32xf32>
    %9 = vector.extract_strided_slice %8 {offsets = [0, 0], sizes = [64, 16], strides = [1, 1]} : vector<64x32xf32> to vector<64x16xf32>
    %10 = vector.extract_strided_slice %8 {offsets = [0, 16], sizes = [64, 16], strides = [1, 1]} : vector<64x32xf32> to vector<64x16xf32>
    %11 = arith.addf %9, %10 : vector<64x16xf32>
    %c0_3 = arith.constant 0 : index
    %c0_4 = arith.constant 0 : index
    %12 = vector.load %arg4[%c0_3, %c0_4] : memref<1x16xf32, #tpu.memory_space<vmem>>, vector<1x16xf32>
    %13 = vector.broadcast %12 : vector<1x16xf32> to vector<64x16xf32>
    %14 = arith.addf %11, %13 : vector<64x16xf32>
    %15 = math.tanh %14 : vector<64x16xf32>
    %c0_5 = arith.constant 0 : index
    %c0_6 = arith.constant 0 : index
    %16 = vector.load %arg5[%c0_5, %c0_6] : memref<1x16xf32, #tpu.memory_space<vmem>>, vector<1x16xf32>
    %17 = vector.broadcast %16 : vector<1x16xf32> to vector<64x16xf32>
    %18 = arith.mulf %15, %17 : vector<64x16xf32>
    %cst_7 = arith.constant dense<0.000000e+00> : vector<64xf32>
    %19 = vector.multi_reduction <add>, %18, %cst_7 [1] : vector<64x16xf32> to vector<64xf32>
    %20 = vector.shape_cast %19 : vector<64xf32> to vector<64x1xf32>
    %c0_8 = arith.constant 0 : index
    %c0_9 = arith.constant 0 : index
    %21 = vector.load %arg6[%c0_8, %c0_9] : memref<1x1xf32, #tpu.memory_space<vmem>>, vector<1x1xf32>
    %22 = vector.broadcast %21 : vector<1x1xf32> to vector<64x1xf32>
    %23 = arith.addf %20, %22 : vector<64x1xf32>
    %24 = vector.shape_cast %23 : vector<64x1xf32> to vector<8x8x1xf32>
    %cst_10 = arith.constant dense<0xFF800000> : vector<8x1xf32>
    %25 = vector.multi_reduction <maximumf>, %24, %cst_10 [1] : vector<8x8x1xf32> to vector<8x1xf32>
    %26 = vector.shape_cast %25 : vector<8x1xf32> to vector<8x1x1xf32>
    %27 = vector.broadcast %26 : vector<8x1x1xf32> to vector<8x8x1xf32>
    %28 = arith.subf %24, %27 : vector<8x8x1xf32>
    %29 = math.exp %28 : vector<8x8x1xf32>
    %cst_11 = arith.constant dense<0.000000e+00> : vector<8x1xf32>
    %30 = vector.multi_reduction <add>, %29, %cst_11 [1] : vector<8x8x1xf32> to vector<8x1xf32>
    %31 = vector.shape_cast %30 : vector<8x1xf32> to vector<8x1x1xf32>
    %32 = vector.broadcast %31 : vector<8x1x1xf32> to vector<8x8x1xf32>
    %33 = arith.divf %29, %32 : vector<8x8x1xf32>
    %34 = vector.shape_cast %33 : vector<8x8x1xf32> to vector<64x1xf32>
    %35 = arith.extf %6 : vector<64x128xbf16> to vector<64x128xf32>
    %36 = vector.broadcast %34 : vector<64x1xf32> to vector<64x128xf32>
    %37 = arith.mulf %36, %35 : vector<64x128xf32>
    %38 = vector.shape_cast %37 : vector<64x128xf32> to vector<8x8x128xf32>
    %cst_12 = arith.constant dense<0.000000e+00> : vector<8x128xf32>
    %39 = vector.multi_reduction <add>, %38, %cst_12 [1] : vector<8x8x128xf32> to vector<8x128xf32>
    %40 = arith.truncf %39 : vector<8x128xf32> to vector<8x128xbf16>
    %41 = arith.extf %40 : vector<8x128xbf16> to vector<8x128xf32>
    %42 = arith.subf %39, %41 : vector<8x128xf32>
    %43 = arith.truncf %42 : vector<8x128xf32> to vector<8x128xbf16>
    %c0_13 = arith.constant 0 : index
    %c0_14 = arith.constant 0 : index
    %44 = vector.load %arg3[%c0_13, %c0_14] : memref<128x64xbf16, #tpu.memory_space<vmem>>, vector<128x64xbf16>
    %cst_15 = arith.constant dense<0.000000e+00> : vector<8x64xf32>
    %45 = tpu.matmul %40, %44, %cst_15 {dimension_numbers = #tpu.dot_dimension_numbers<[1], [0], [0], [1], [0, 0, 1, 1], [], []>} : vector<8x128xbf16>, vector<128x64xbf16>, vector<8x64xf32> -> vector<8x64xf32>
    %c0_16 = arith.constant 0 : index
    %c0_17 = arith.constant 0 : index
    %46 = vector.load %arg3[%c0_16, %c0_17] : memref<128x64xbf16, #tpu.memory_space<vmem>>, vector<128x64xbf16>
    %cst_18 = arith.constant dense<0.000000e+00> : vector<8x64xf32>
    %47 = tpu.matmul %43, %46, %cst_18 {dimension_numbers = #tpu.dot_dimension_numbers<[1], [0], [0], [1], [0, 0, 1, 1], [], []>} : vector<8x128xbf16>, vector<128x64xbf16>, vector<8x64xf32> -> vector<8x64xf32>
    %48 = arith.addf %45, %47 : vector<8x64xf32>
    %49 = vector.extract_strided_slice %48 {offsets = [0, 0], sizes = [8, 32], strides = [1, 1]} : vector<8x64xf32> to vector<8x32xf32>
    %50 = vector.extract_strided_slice %48 {offsets = [0, 32], sizes = [8, 32], strides = [1, 1]} : vector<8x64xf32> to vector<8x32xf32>
    %51 = arith.addf %49, %50 : vector<8x32xf32>
    %c0_19 = arith.constant 0 : index
    %c0_20 = arith.constant 0 : index
    %52 = vector.load %arg7[%c0_19, %c0_20] : memref<8x32xf32, #tpu.memory_space<vmem>>, vector<8x32xf32>
    tpu.vector_store %arg7[%c0_19, %c0_20], %51 {strides = array<i32>} : memref<8x32xf32, #tpu.memory_space<vmem>>, vector<8x32xf32>,
    return
  }
  func.func @transform_0(%arg0: i32) -> (i32, i32) {
    %c0_i32 = arith.constant 0 : i32
    %c0_i32_0 = arith.constant 0 : i32
    return %arg0, %c0_i32 : i32, i32
  }
  func.func @transform_1(%arg0: i32) -> (i32, i32) {
    %c0_i32 = arith.constant 0 : i32
    %c0_i32_0 = arith.constant 0 : i32
    %c0_i32_1 = arith.constant 0 : i32
    return %c0_i32, %c0_i32_0 : i32, i32
  }
  func.func @transform_2(%arg0: i32) -> (i32, i32) {
    %c0_i32 = arith.constant 0 : i32
    %c0_i32_0 = arith.constant 0 : i32
    %c0_i32_1 = arith.constant 0 : i32
    return %c0_i32, %c0_i32_0 : i32, i32
  }
  func.func @transform_3(%arg0: i32) -> (i32, i32) {
    %c0_i32 = arith.constant 0 : i32
    %c0_i32_0 = arith.constant 0 : i32
    %c0_i32_1 = arith.constant 0 : i32
    return %c0_i32, %c0_i32_0 : i32, i32
  }
  func.func @transform_4(%arg0: i32) -> (i32, i32) {
    %c0_i32 = arith.constant 0 : i32
    %c0_i32_0 = arith.constant 0 : i32
    %c0_i32_1 = arith.constant 0 : i32
    return %c0_i32, %c0_i32_0 : i32, i32
  }
  func.func @transform_5(%arg0: i32) -> (i32, i32) {
    %c0_i32 = arith.constant 0 : i32
    %c0_i32_0 = arith.constant 0 : i32
    %c0_i32_1 = arith.constant 0 : i32
    return %c0_i32, %c0_i32_0 : i32, i32
  }
  func.func @transform_6(%arg0: i32) -> (i32, i32) {
    %c0_i32 = arith.constant 0 : i32
    %c0_i32_0 = arith.constant 0 : i32
    return %arg0, %c0_i32 : i32, i32
  }
}

</mosaic_0001>

<bundles_post_ra>
// kernel: tpu_custom_call.1
= control target key start
LH: loop header
LB: loop body
LE: loop exit
PB: predicated region body
PF: predicated region fallthrough
CT: control target
= control target key end

     0   :  { %s1412_s0 = inlined_call_operand.vmem [shape: s32[64,1], index: 0, kind: input, shape index: {}]   ;;  %s1413_s1 = inlined_call_operand.vmem [shape: bf16[128,32], index: 1, kind: input, shape index: {}]   ;;  %s1414_s2 = inlined_call_operand.vmem [shape: bf16[128,64], index: 2, kind: input, shape index: {}]   ;;  %s1415_s3 = inlined_call_operand.vmem [shape: f32[1,16], index: 3, kind: input, shape index: {}]   ;;  %s1416_s4 = inlined_call_operand.vmem [shape: f32[1,16], index: 4, kind: input, shape index: {}]   ;;  %s1417_s5 = inlined_call_operand.<no memory space> [shape: f32[1,1], index: 5, kind: input, shape index: {}]   ;;  %s1418_s6 = inlined_call_operand.hbm [shape: f32[8,32], index: 6, kind: output, shape index: {}]  }
   0x1   :  { %v11_v0 = vstv %s1417_s5 }
   0x2   :  { %12 = vst [vmem:[#allocation2] sm:$0x1] %v11_v0 }
   0x3   :  { %v29_v1 = vld [vmem:[%s1412_s0 + $0x10] sm:$0xff]  ;;  %v27_v2 = vld [vmem:[%s1412_s0] sm:$0xff]  ;;  %v1077_v3 = vmov 0   ;;  %v30_v4 = vld [vmem:[%s1412_s0 + $0x18] sm:$0xff]  ;;  %v1078_v10 = vmov 0.0  }
   0x4   :  { %988 = vset.pattern.permute.xlu1 %v1077_v3  ;;  %987 = vset.pattern.permute.xlu0 %v1077_v3  ;;  %v28_v5 = vld [vmem:[%s1412_s0 + $0x8] sm:$0xff]  ;;  %v989_v6 = vld [vmem:[%s1413_s1] sm:$0xff]   ;;  %v991_v11 = vld [vmem:[%s1413_s1 + $0x10] sm:$0xff]  }
   0x5   :  { %44 = vperm.xlu1 %988, %v29_v1   ;;  %38 = vperm.xlu0 %987, %v27_v2   ;;  %v990_v7 = vld [vmem:[%s1413_s1 + $0x8] sm:$0xff]   ;;  %v31_v9 = vld [vmem:[%s1412_s0 + $0x20] sm:$0xff]  ;;  %v34_v12 = vld [vmem:[%s1412_s0 + $0x38] sm:$0xff] }
   0x6   :  { %912 = vmatprep.subr.bf16.mxu0 %v989_v6  ;;  %v32_v8 = vld [vmem:[%s1412_s0 + $0x28] sm:$0xff]  ;;  %936 = vmatprep.subr.bf16.mxu1 %v1078_v10  ;;  %v33_v13 = vld [vmem:[%s1412_s0 + $0x30] sm:$0xff]  ;;  %v992_v14 = vld [vmem:[%s1413_s1 + $0x18] sm:$0xff]  }
   0x7   :  { %913 = vmatpush3.bf16.msra.mxu0 %v989_v6  ;;  %v993_v15 = vld [vmem:[%s1413_s1 + $0x20] sm:$0xff]  }
   0x8   :  { %914 = vmatprep.subr.bf16.mxu0 %v990_v7 }
   0x9   :  { %47 = vperm.xlu1 %988, %v30_v4   ;;  %41 = vperm.xlu0 %987, %v28_v5  }
   0xb   :  { %915 = vmatpush3.bf16.msra.mxu0 %v990_v7 }
   0xc   :  { %916 = vmatprep.subr.bf16.mxu0 %v991_v11 }
   0xd   :  { %53 = vperm.xlu1 %988, %v32_v8   ;;  %50 = vperm.xlu0 %987, %v31_v9  }
   0xf   :  { %917 = vmatpush3.bf16.msra.mxu0 %v991_v11 }
  0x10   :  { %918 = vmatprep.subr.bf16.mxu0 %v992_v14 }
  0x11   :  { %59 = vperm.xlu1 %988, %v34_v12   ;;  %56 = vperm.xlu0 %987, %v33_v13  }
  0x12   :  { %13 = vsyncpa [#allocation4], 0  ;;  %v994_v16 = vld [vmem:[%s1413_s1 + $0x28] sm:$0xff]   ;;  %v995_v17 = vld [vmem:[%s1413_s1 + $0x30] sm:$0xff]   ;;  %v35_v19 = vlaneseq  ;;  %v1079_v25 = vmov 1.0|1.0  }
  0x13   :  { %919 = vmatpush3.bf16.msra.mxu0 %v992_v14  ;;  %v996_v18 = vld [vmem:[%s1413_s1 + $0x38] sm:$0xff]   ;;  %s1080_s1 = smov 112   ;;  %v871_v38 = vld [vmem:[%s1415_s3] ss:$0 sm:$0xff]  ;;  %vm296_vm12 = vcmask 130048   ;;  %vm336_vm13 = vcmask 7168  }
  0x14   :  { %920 = vmatprep.subr.bf16.mxu0 %v993_v15  ;;  %v1175_v22 = vand.u32 127, %v35_v19  ;;  %v872_v57 = vld [vmem:[%s1416_s4] ss:$0 sm:$0xff]  ;;  %vm1081_vm14 = vmmov 0   ;;  %vm657_vm15 = vcmask 1041409   ;;  %s1083_s22 = smov [#allocation3]  }
  0x15   :  { %952 = vmatprep.mubr.msk.bf16.mxu1 %vm1081_vm14, %v1078_v10  ;;  %s839_s23 = sshll.u32 %s1083_s22, 4  ;;  %s840_s23 = int_to_ptr.vmem [resolvable:$true] %s839_s23 }
  0x16   :  { %s1053_s24 = scalar_lea.vmem %s840_s23, 128  ;;  %p1058_p1 = scmp.lt.s32.totalorder %s840_s23, %s840_s23 }
  0x17   :  { %921 = vmatpush3.bf16.msra.mxu0 %v993_v15  ;;  %p1054_p0 = scmp.ne.s32.totalorder %s840_s23, %s1053_s24  ;;  %p1059_p2 = scmp.lt.s32.totalorder %s1053_s24, %s1053_s24 }
  0x18   :  { %922 = vmatprep.subr.bf16.mxu0 %v994_v16 }
  0x19   :  { %p1060_p3 = por %p1059_p2, %p1058_p1 }
  0x1b   :  { %923 = vmatpush3.bf16.msra.mxu0 %v994_v16  ;;  %p1061_p4 = pnand %p1060_p3, %p1054_p0 }
  0x1c   :  { %924 = vmatprep.subr.bf16.mxu0 %v995_v17 }
  0x1f   :  { %925 = vmatpush3.bf16.msra.mxu0 %v995_v17 }
  0x20   :  { %926 = vmatprep.subr.bf16.mxu0 %v996_v18 }
  0x23   :  { %927 = vmatpush3.bf16.msra.mxu0 %v996_v18 }
  0x84   :  { %v1171_v20 = vpop.permute.xlu1 %44  ;;  %v1173_v21 = vpop.permute.xlu0 %38 }
  0x85   :  { %vm63_vm0 = vcmp.eq.s32.totalorder %v1175_v22, %v1171_v20  ;;  %vm61_vm3 = vcmp.eq.s32.totalorder %v1175_v22, %v1173_v21 }
  0x88   :  { %v1177_v23 = vpop.permute.xlu1 %47  ;;  %v1179_v24 = vpop.permute.xlu0 %41 }
  0x89   :  { %vm64_vm1 = vcmp.eq.s32.totalorder %v1175_v22, %v1177_v23  ;;  %vm62_vm2 = vcmp.eq.s32.totalorder %v1175_v22, %v1179_v24 }
  0x8a   :  { %vm865_vm4 = vmpackc.low %vm64_vm1, %vm63_vm0 }
  0x8b   :  { %vm863_vm5 = vmpackc.low %vm62_vm2, %vm61_vm3 }
  0x8c   :  { %928 = vmatprep.mubr.msk.bf16.mxu0 %vm863_vm5, %v1079_v25  ;;  %v1201_v26 = vpop.permute.xlu1 %53  ;;  %v1203_v27 = vpop.permute.xlu0 %50  ;;  %vm669_vm5 = vcmask 1047559  }
  0x8d   :  { %vm66_vm6 = vcmp.eq.s32.totalorder %v1175_v22, %v1201_v26  ;;  %929 = vmatmul.mubr.msk.bf16.vlgmr.msra.gmra.mrb[0].mxu0 %vm865_vm4, %v1079_v25  ;;  %vm65_vm7 = vcmp.eq.s32.totalorder %v1175_v22, %v1203_v27  ;;  %vm667_vm4 = vcmask 1046534  }
  0x8e   :  { %vm867_vm8 = vmpackc.low %vm66_vm6, %vm65_vm7  ;;  %v851_v24 = vsel %vm65_vm7, 1.0, %v1078_v10 }
  0x8f   :  { %932 = vmatprep.mubr.msk.bf16.mxu0 %vm867_vm8, %v1079_v25 }
  0x90   :  { %v1215_v28 = vpop.permute.xlu1 %59  ;;  %v1217_v29 = vpop.permute.xlu0 %56 }
  0x91   :  { %vm68_vm9 = vcmp.eq.s32.totalorder %v1175_v22, %v1215_v28  ;;  %vm67_vm10 = vcmp.eq.s32.totalorder %v1175_v22, %v1217_v29 }
  0x92   :  { %vm869_vm11 = vmpackc.low %vm68_vm9, %vm67_vm10  ;;  %v854_v27 = vsel %vm68_vm9, 1.0, %v1078_v10 }
  0x95   :  { %933 = vmatmul.mubr.msk.bf16.gmra.mrb[4].mxu0 %vm869_vm11, %v1079_v25 }
 0x160   :  { %v930_v30 = vpop.f32.mrb[0].mxu0 }
 0x161   :  { %230 = vrot.lane.b32.xlu0 %v930_v30, %s1080_s1  ;;  %v187_v31 = vpop.f32.mrb[1].mxu0 }
 0x162   :  { %v931_v32 = vpop.f32.mrb[2].mxu0 }
 0x163   :  { %232 = vrot.lane.b32.xlu1 %v931_v32, %s1080_s1  ;;  %v190_v33 = vpop.f32.mrb[3].mxu0 }
 0x165   :  { %226 = vrot.lane.b32.xlu0 %v187_v31, %s1080_s1 }
 0x167   :  { %228 = vrot.lane.b32.xlu1 %v190_v33, %s1080_s1 }
 0x168   :  { %v934_v34 = vpop.f32.mrb[4].mxu0 }
 0x169   :  { %v203_v35 = vpop.f32.mrb[5].mxu0 }
 0x16a   :  { %234 = vrot.lane.b32.xlu0 %v203_v35, %s1080_s1  ;;  %v935_v36 = vpop.f32.mrb[6].mxu0 }
 0x16b   :  { %v206_v37 = vpop.f32.mrb[7].mxu0 }
 0x16c   :  { %236 = vrot.lane.b32.xlu1 %v206_v37, %s1080_s1 }
 0x16e   :  { %238 = vrot.lane.b32.xlu0 %v934_v34, %s1080_s1 }
 0x170   :  { %240 = vrot.lane.b32.xlu1 %v935_v36, %s1080_s1 }
 0x1d3   :  { %v231_v39 = vpop.permute.xlu0 %230 }
 0x1d4   :  { %v252_v40 = vadd.f32 %v930_v30, %v231_v39 }
 0x1d5   :  { %v233_v41 = vpop.permute.xlu1 %232 }
 0x1d6   :  { %v267_v42 = vadd.f32 %v871_v38, %v252_v40  ;;  %v253_v43 = vadd.f32 %v931_v32, %v233_v41 }
 0x1d7   :  { %v227_v44 = vpop.permute.xlu0 %226 }
 0x1d8   :  { %1005 = vtanh.f32 %v267_v42  ;;  %v268_v45 = vadd.f32 %v871_v38, %v253_v43  ;;  %v250_v46 = vadd.f32 %v227_v44, %v187_v31 }
 0x1d9   :  { %v229_v47 = vpop.permute.xlu1 %228 }
 0x1da   :  { %v265_v48 = vadd.f32 %v871_v38, %v250_v46  ;;  %v251_v49 = vadd.f32 %v229_v47, %v190_v33  ;;  %1007 = vtanh.f32 %v268_v45 }
 0x1dc   :  { %1009 = vtanh.f32 %v265_v48  ;;  %v266_v50 = vadd.f32 %v871_v38, %v251_v49  ;;  %v235_v51 = vpop.permute.xlu0 %234 }
 0x1dd   :  { %v254_v52 = vadd.f32 %v235_v51, %v203_v35 }
 0x1de   :  { %1011 = vtanh.f32 %v266_v50  ;;  %v237_v53 = vpop.permute.xlu1 %236 }
 0x1df   :  { %v269_v54 = vadd.f32 %v871_v38, %v254_v52  ;;  %v255_v55 = vadd.f32 %v237_v53, %v206_v37 }
 0x1e0   :  { %v239_v56 = vpop.permute.xlu0 %238 }
 0x1e1   :  { %1013 = vtanh.f32 %v269_v54  ;;  %v270_v58 = vadd.f32 %v871_v38, %v255_v55  ;;  %v256_v59 = vadd.f32 %v934_v34, %v239_v56  ;;  %v873_v34 = vld [vmem:[#allocation2] ss:$0 sm:$0xff] }
 0x1e2   :  { %v1006_v60 = vpop.eup %1005  ;;  %v241_v61 = vpop.permute.xlu1 %240 }
 0x1e3   :  { %1015 = vtanh.f32 %v270_v58  ;;  %v271_v62 = vadd.f32 %v871_v38, %v256_v59  ;;  %v257_v63 = vadd.f32 %v935_v36, %v241_v61  ;;  %v290_v0 = vmul.f32 %v1006_v60, %v872_v57 }
 0x1e4   :  { %v1008_v1 = vpop.eup %1007 }
 0x1e5   :  { %1017 = vtanh.f32 %v271_v62  ;;  %v272_v2 = vadd.f32 %v871_v38, %v257_v63  ;;  %v303_v3 = vsel %vm296_vm12, %v290_v0, 0.0  ;;  %v291_v9 = vmul.f32 %v1008_v1, %v872_v57 }
 0x1e6   :  { %v1010_v4 = vpop.eup %1009  ;;  %304 = vadd.xlane.f32.xlu0 %v303_v3 }
 0x1e7   :  { %1019 = vtanh.f32 %v272_v2  ;;  %v288_v5 = vmul.f32 %v1010_v4, %v872_v57  ;;  %v306_v15 = vsel %vm296_vm12, %v291_v9, 0.0 }
 0x1e8   :  { %v1012_v6 = vpop.eup %1011 }
 0x1e9   :  { %v297_v7 = vsel %vm296_vm12, %v288_v5, 0.0  ;;  %v289_v8 = vmul.f32 %v1012_v6, %v872_v57 }
 0x1ea   :  { %298 = vadd.xlane.f32.xlu0 %v297_v7 }
 0x1eb   :  { %v1014_v11 = vpop.eup %1013  ;;  %v300_v12 = vsel %vm296_vm12, %v289_v8, 0.0 }
 0x1ec   :  { %301 = vadd.xlane.f32.xlu1 %v300_v12  ;;  %v292_v13 = vmul.f32 %v1014_v11, %v872_v57 }
 0x1ed   :  { %v1016_v14 = vpop.eup %1015 }
 0x1ee   :  { %307 = vadd.xlane.f32.xlu0 %v306_v15  ;;  %v309_v16 = vsel %vm296_vm12, %v292_v13, 0.0  ;;  %v293_v17 = vmul.f32 %v1016_v14, %v872_v57 }
 0x1ef   :  { %v1018_v18 = vpop.eup %1017 }
 0x1f0   :  { %310 = vadd.xlane.f32.xlu1 %v309_v16  ;;  %v312_v19 = vsel %vm296_vm12, %v293_v17, 0.0  ;;  %v294_v25 = vmul.f32 %v1018_v18, %v872_v57 }
 0x1f1   :  { %v1020_v30 = vpop.eup %1019 }
 0x1f2   :  { %313 = vadd.xlane.f32.xlu0 %v312_v19  ;;  %v315_v31 = vsel %vm296_vm12, %v294_v25, 0.0  ;;  %v295_v32 = vmul.f32 %v1020_v30, %v872_v57 }
 0x1f4   :  { %316 = vadd.xlane.f32.xlu1 %v315_v31  ;;  %v318_v33 = vsel %vm296_vm12, %v295_v32, 0.0 }
 0x1f6   :  { %319 = vadd.xlane.f32.xlu0 %v318_v33 }
 0x273   :  { %v305_v35 = vpop.xlane.xlu0 %304 }
 0x274   :  { %v330_v36 = vadd.f32 %v873_v34, %v305_v35 }
 0x276   :  { %v351_v37 = vsel %vm336_vm13, %v330_v36, -inf }
 0x277   :  { %v352_v38 = vrot.slane %v351_v37, 4  ;;  %v299_v39 = vpop.xlane.xlu0 %298 }
 0x278   :  { %v328_v40 = vadd.f32 %v873_v34, %v299_v39 }
 0x279   :  { %v353_v41 = vmax.f32 %v351_v37, %v352_v38  ;;  %v302_v42 = vpop.xlane.xlu1 %301 }
 0x27a   :  { %v337_v43 = vsel %vm336_vm13, %v328_v40, -inf  ;;  %v329_v44 = vadd.f32 %v873_v34, %v302_v42 }
 0x27b   :  { %v354_v45 = vrot.slane %v353_v41, 2  ;;  %v338_v46 = vrot.slane %v337_v43, 4  ;;  %v308_v47 = vpop.xlane.xlu0 %307 }
 0x27c   :  { %v344_v48 = vsel %vm336_vm13, %v329_v44, -inf  ;;  %v331_v49 = vadd.f32 %v873_v34, %v308_v47 }
 0x27d   :  { %v355_v50 = vmax.f32 %v353_v41, %v354_v45  ;;  %v339_v51 = vmax.f32 %v337_v43, %v338_v46  ;;  %v345_v52 = vrot.slane %v344_v48, 4  ;;  %v311_v53 = vpop.xlane.xlu1 %310 }
 0x27e   :  { %v358_v54 = vsel %vm336_vm13, %v331_v49, -inf  ;;  %v332_v55 = vadd.f32 %v873_v34, %v311_v53 }
 0x27f   :  { %v356_v56 = vrot.slane %v355_v50, 1  ;;  %v340_v57 = vrot.slane %v339_v51, 2  ;;  %v346_v58 = vmax.f32 %v344_v48, %v345_v52  ;;  %v359_v59 = vrot.slane %v358_v54, 4  ;;  %v314_v60 = vpop.xlane.xlu0 %313 }
 0x280   :  { %v365_v61 = vsel %vm336_vm13, %v332_v55, -inf  ;;  %v333_v62 = vadd.f32 %v873_v34, %v314_v60 }
 0x281   :  { %v357_v63 = vmax.f32 %v355_v50, %v356_v56  ;;  %v341_v0 = vmax.f32 %v339_v51, %v340_v57  ;;  %v347_v1 = vrot.slane %v346_v58, 2  ;;  %v360_v2 = vmax.f32 %v358_v54, %v359_v59  ;;  %v317_v3 = vpop.xlane.xlu1 %316 }
 0x282   :  { %v366_v4 = vrot.slane %v365_v61, 4  ;;  %v372_v5 = vsel %vm336_vm13, %v333_v62, -inf  ;;  %v334_v6 = vadd.f32 %v873_v34, %v317_v3 }
 0x283   :  { %v395_v7 = vsub.f32 %v330_v36, %v357_v63  ;;  %v342_v8 = vrot.slane %v341_v0, 1  ;;  %v348_v9 = vmax.f32 %v346_v58, %v347_v1  ;;  %v361_v11 = vrot.slane %v360_v2, 2  ;;  %v320_v12 = vpop.xlane.xlu0 %319 }
 0x284   :  { %v367_v13 = vmax.f32 %v365_v61, %v366_v4  ;;  %v373_v14 = vrot.slane %v372_v5, 4  ;;  %v379_v15 = vsel %vm336_vm13, %v334_v6, -inf  ;;  %v335_v16 = vadd.f32 %v873_v34, %v320_v12 }
 0x285   :  { %v405_v17 = vmul.f32 1.442695, %v395_v7  ;;  %v343_v18 = vmax.f32 %v341_v0, %v342_v8  ;;  %v349_v19 = vrot.slane %v348_v9, 1  ;;  %v362_v25 = vmax.f32 %v360_v2, %v361_v11 }
 0x286   :  { %v368_v30 = vrot.slane %v367_v13, 2  ;;  %v374_v31 = vmax.f32 %v372_v5, %v373_v14  ;;  %v380_v32 = vrot.slane %v379_v15, 4  ;;  %v386_v33 = vsel %vm336_vm13, %v335_v16, -inf }
 0x287   :  { %1021 = vpow2.f32 %v405_v17  ;;  %v393_v35 = vsub.f32 %v328_v40, %v343_v18  ;;  %v350_v36 = vmax.f32 %v348_v9, %v349_v19  ;;  %v363_v37 = vrot.slane %v362_v25, 1 }
 0x288   :  { %v369_v38 = vmax.f32 %v367_v13, %v368_v30  ;;  %v375_v39 = vrot.slane %v374_v31, 2  ;;  %v381_v41 = vmax.f32 %v379_v15, %v380_v32  ;;  %v387_v42 = vrot.slane %v386_v33, 4 }
 0x289   :  { %v401_v43 = vmul.f32 1.442695, %v393_v35  ;;  %v394_v45 = vsub.f32 %v329_v44, %v350_v36  ;;  %v364_v34 = vmax.f32 %v362_v25, %v363_v37 }
 0x28a   :  { %v370_v46 = vrot.slane %v369_v38, 1  ;;  %v376_v47 = vmax.f32 %v374_v31, %v375_v39  ;;  %v382_v48 = vrot.slane %v381_v41, 2  ;;  %v388_v50 = vmax.f32 %v386_v33, %v387_v42 }
 0x28b   :  { %1023 = vpow2.f32 %v401_v43  ;;  %v403_v51 = vmul.f32 1.442695, %v394_v45  ;;  %v396_v52 = vsub.f32 %v331_v49, %v364_v34 }
 0x28c   :  { %v371_v53 = vmax.f32 %v369_v38, %v370_v46  ;;  %v377_v54 = vrot.slane %v376_v47, 1  ;;  %v383_v56 = vmax.f32 %v381_v41, %v382_v48  ;;  %v389_v40 = vrot.slane %v388_v50, 2 }
 0x28d   :  { %1025 = vpow2.f32 %v403_v51  ;;  %v407_v57 = vmul.f32 1.442695, %v396_v52 }
 0x28e   :  { %v397_v58 = vsub.f32 %v332_v55, %v371_v53  ;;  %v378_v59 = vmax.f32 %v376_v47, %v377_v54  ;;  %v384_v60 = vrot.slane %v383_v56, 1  ;;  %v390_v61 = vmax.f32 %v388_v50, %v389_v40 }
 0x28f   :  { %1027 = vpow2.f32 %v407_v57 }
 0x290   :  { %v409_v44 = vmul.f32 1.442695, %v397_v58  ;;  %v398_v63 = vsub.f32 %v333_v62, %v378_v59  ;;  %v385_v0 = vmax.f32 %v383_v56, %v384_v60  ;;  %v391_v1 = vrot.slane %v390_v61, 1 }
 0x291   :  { %v1251_v2 = vpop.eup %1021 }
 0x292   :  { %v431_v49 = vsel %vm336_vm13, %v1251_v2, 0.0  ;;  %1029 = vpow2.f32 %v409_v44  ;;  %v411_v3 = vmul.f32 1.442695, %v398_v63  ;;  %v399_v4 = vsub.f32 %v334_v6, %v385_v0 }
 0x293   :  { %v432_v5 = vrot.slane %v431_v49, 4  ;;  %v392_v7 = vmax.f32 %v390_v61, %v391_v1 }
 0x294   :  { %1031 = vpow2.f32 %v411_v3  ;;  %v413_v55 = vmul.f32 1.442695, %v399_v4 }
 0x295   :  { %v1255_v8 = vpop.eup %1023  ;;  %v433_v9 = vadd.f32 %v432_v5, %v431_v49  ;;  %v400_v11 = vsub.f32 %v335_v16, %v392_v7 }
 0x296   :  { %v417_v62 = vsel %vm336_vm13, %v1255_v8, 0.0  ;;  %1033 = vpow2.f32 %v413_v55 }
 0x297   :  { %v1259_v12 = vpop.eup %1025  ;;  %v434_v13 = vrot.slane %v433_v9, 2  ;;  %v418_v14 = vrot.slane %v417_v62, 4  ;;  %v415_v15 = vmul.f32 1.442695, %v400_v11 }
 0x298   :  { %v424_v6 = vsel %vm336_vm13, %v1259_v12, 0.0 }
 0x299   :  { %v1263_v17 = vpop.eup %1027  ;;  %v419_v18 = vadd.f32 %v418_v14, %v417_v62  ;;  %v425_v19 = vrot.slane %v424_v6, 4  ;;  %1035 = vpow2.f32 %v415_v15  ;;  %v435_v25 = vadd.f32 %v434_v13, %v433_v9 }
 0x29a   :  { %v438_v16 = vsel %vm336_vm13, %v1263_v17, 0.0 }
 0x29b   :  { %v420_v30 = vrot.slane %v419_v18, 2  ;;  %v426_v31 = vadd.f32 %v425_v19, %v424_v6  ;;  %v439_v32 = vrot.slane %v438_v16, 4  ;;  %v436_v33 = vrot.slane %v435_v25, 1 }
 0x29c   :  { %v1267_v35 = vpop.eup %1029 }
 0x29d   :  { %v427_v36 = vrot.slane %v426_v31, 2  ;;  %v440_v37 = vadd.f32 %v439_v32, %v438_v16  ;;  %v445_v38 = vsel %vm336_vm13, %v1267_v35, 0.0  ;;  %v437_v39 = vadd.f32 %v436_v33, %v435_v25 }
 0x29e   :  { %v1271_v41 = vpop.eup %1031  ;;  %v446_v42 = vrot.slane %v445_v38, 4  ;;  %v421_v43 = vadd.f32 %v420_v30, %v419_v18 }
 0x29f   :  { %v441_v45 = vrot.slane %v440_v37, 2  ;;  %v452_v34 = vsel %vm336_vm13, %v1271_v41, 0.0  ;;  %1037 = vrcp.f32 %v437_v39  ;;  %v428_v46 = vadd.f32 %v427_v36, %v426_v31 }
 0x2a0   :  { %v1034_v47 = vpop.eup %1033  ;;  %v447_v48 = vadd.f32 %v446_v42, %v445_v38  ;;  %v453_v50 = vrot.slane %v452_v34, 4  ;;  %v422_v51 = vrot.slane %v421_v43, 1 }
 0x2a1   :  { %v459_v52 = vsel %vm336_vm13, %v1034_v47, 0.0  ;;  %v429_v53 = vrot.slane %v428_v46, 1  ;;  %v442_v54 = vadd.f32 %v441_v45, %v440_v37 }
 0x2a2   :  { %v448_v56 = vrot.slane %v447_v48, 2  ;;  %v454_v40 = vadd.f32 %v453_v50, %v452_v34  ;;  %v460_v57 = vrot.slane %v459_v52, 4  ;;  %v423_v58 = vadd.f32 %v422_v51, %v421_v43  ;;  %v1328_v50 = vld [vmem:[%s1414_s2 + $0x30] sm:$0xff]   ;;  %v1335_v51 = vld [vmem:[%s1414_s2 + $0x38] sm:$0xff]  }
 0x2a3   :  { %v1036_v59 = vpop.eup %1035  ;;  %v430_v60 = vadd.f32 %v429_v53, %v428_v46  ;;  %v443_v61 = vrot.slane %v442_v54, 1  ;;  %v1307_v46 = vld [vmem:[%s1414_s2 + $0x18] sm:$0xff]  }
 0x2a4   :  { %v455_v44 = vrot.slane %v454_v40, 2  ;;  %v461_v63 = vadd.f32 %v460_v57, %v459_v52  ;;  %v466_v0 = vsel %vm336_vm13, %v1036_v59, 0.0  ;;  %1039 = vrcp.f32 %v423_v58 }
 0x2a5   :  { %v467_v1 = vrot.slane %v466_v0, 4  ;;  %1041 = vrcp.f32 %v430_v60  ;;  %v444_v49 = vadd.f32 %v443_v61, %v442_v54  ;;  %v449_v3 = vadd.f32 %v448_v56, %v447_v48  ;;  %v1321_v48 = vld [vmem:[%s1414_s2 + $0x28] sm:$0xff]  }
 0x2a6   :  { %v462_v4 = vrot.slane %v461_v63, 2  ;;  %v456_v5 = vadd.f32 %v455_v44, %v454_v40  ;;  %v849_v52 = vsel %vm63_vm0, 1.0, %v1078_v10  ;;  %v847_v57 = vsel %vm61_vm3, 1.0, %v1078_v10 }
 0x2a7   :  { %v468_v7 = vadd.f32 %v467_v1, %v466_v0  ;;  %1043 = vrcp.f32 %v444_v49  ;;  %v450_v55 = vrot.slane %v449_v3, 1  ;;  %v848_v60 = vsel %vm62_vm2, 1.0, %v1078_v10 }
 0x2a8   :  { %v457_v9 = vrot.slane %v456_v5, 1  ;;  %v463_v11 = vadd.f32 %v462_v4, %v461_v63  ;;  %v850_v49 = vsel %vm64_vm1, 1.0, %v1078_v10  ;;  %vm659_vm0 = vcmask 1042434  }
 0x2a9   :  { %v1038_v62 = vpop.eup %1037  ;;  %v469_v13 = vrot.slane %v468_v7, 2  ;;  %v451_v14 = vadd.f32 %v450_v55, %v449_v3  ;;  %vm661_vm1 = vcmask 1043459   ;;  %vm663_vm2 = vcmask 1044484  }
 0x2aa   :  { %v478_v15 = vmul.f32 %v1038_v62, %v1251_v2  ;;  %v458_v6 = vadd.f32 %v457_v9, %v456_v5  ;;  %v464_v18 = vrot.slane %v463_v11, 1  ;;  %v852_v62 = vsel %vm66_vm6, 1.0, %v1078_v10 }
 0x2ab   :  { %1045 = vrcp.f32 %v451_v14  ;;  %v470_v19 = vadd.f32 %v469_v13, %v468_v7  ;;  %vm665_vm3 = vcmask 1045509   ;;  %vm831_vm6 = vcmask 261120  }
 0x2ac   :  { %509 = vperm.xlu1 %988, %v478_v15   ;;  %1047 = vrcp.f32 %v458_v6  ;;  %v465_v25 = vadd.f32 %v464_v18, %v463_v11  ;;  %v853_v6 = vsel %vm67_vm10, 1.0, %v1078_v10 }
 0x2ad   :  { %v471_v16 = vrot.slane %v470_v19, 1 }
 0x2ae   :  { %v1040_v30 = vpop.eup %1039  ;;  %1049 = vrcp.f32 %v465_v25 }
 0x2af   :  { %v1042_v31 = vpop.eup %1041  ;;  %v474_v32 = vmul.f32 %v1040_v30, %v1255_v8  ;;  %v472_v33 = vadd.f32 %v471_v16, %v470_v19  ;;  %v1286_v8 = vld [vmem:[%s1414_s2] sm:$0xff]  }
 0x2b0   :  { %v476_v36 = vmul.f32 %v1042_v31, %v1259_v12  ;;  %937 = vmatpush3.bf16.msra.mxu1 %v1286_v8 }
 0x2b1   :  { %v1044_v37 = vpop.eup %1043  ;;  %499 = vperm.xlu1 %988, %v474_v32   ;;  %1051 = vrcp.f32 %v472_v33  ;;  %938 = vmatprep.subr.bf16.mxu1 %v1078_v10 }
 0x2b2   :  { %504 = vperm.xlu0 %987, %v476_v36   ;;  %v480_v2 = vmul.f32 %v1044_v37, %v1263_v17 }
 0x2b5   :  { %v1046_v38 = vpop.eup %1045  ;;  %514 = vperm.xlu1 %988, %v480_v2  }
 0x2b6   :  { %v1048_v39 = vpop.eup %1047  ;;  %v482_v42 = vmul.f32 %v1046_v38, %v1267_v35  ;;  %v1293_v35 = vld [vmem:[%s1414_s2 + $0x8] sm:$0xff]  }
 0x2b7   :  { %v484_v43 = vmul.f32 %v1048_v39, %v1271_v41  ;;  %939 = vmatpush3.bf16.msra.mxu1 %v1293_v35  ;;  %v1300_v41 = vld [vmem:[%s1414_s2 + $0x10] sm:$0xff]  }
 0x2b8   :  { %v1050_v45 = vpop.eup %1049  ;;  %519 = vperm.xlu0 %987, %v482_v42   ;;  %940 = vmatprep.subr.bf16.mxu1 %v1078_v10 }
 0x2b9   :  { %524 = vperm.xlu1 %988, %v484_v43   ;;  %v486_v12 = vmul.f32 %v1050_v45, %v1034_v47  ;;  %v1314_v47 = vld [vmem:[%s1414_s2 + $0x20] sm:$0xff]   ;;  %s1082_s2 = smov 96  }
 0x2bb   :  { %v1052_v17 = vpop.eup %1051  ;;  %941 = vmatpush3.bf16.msra.mxu1 %v1300_v41 }
 0x2bc   :  { %529 = vperm.xlu0 %987, %v486_v12   ;;  %v488_v34 = vmul.f32 %v1052_v17, %v1036_v59  ;;  %942 = vmatprep.subr.bf16.mxu1 %v1078_v10 }
 0x2be   :  { %534 = vperm.xlu1 %988, %v488_v34  }
 0x2bf   :  { %943 = vmatpush3.bf16.msra.mxu1 %v1307_v46 }
 0x2c0   :  { %944 = vmatprep.subr.bf16.mxu1 %v1078_v10 }
 0x2c3   :  { %945 = vmatpush3.bf16.msra.mxu1 %v1314_v47 }
 0x2c4   :  { %946 = vmatprep.subr.bf16.mxu1 %v1078_v10 }
 0x2c7   :  { %947 = vmatpush3.bf16.msra.mxu1 %v1321_v48 }
 0x2c8   :  { %948 = vmatprep.subr.bf16.mxu1 %v1078_v10 }
 0x2cb   :  { %949 = vmatpush3.bf16.msra.mxu1 %v1328_v50 }
 0x2cc   :  { %950 = vmatprep.subr.bf16.mxu1 %v1078_v10 }
 0x2cf   :  { %951 = vmatpush3.bf16.msra.mxu1 %v1335_v51 }
 0x2d0   :  { %956 = vmatprep.subr.bf16.mxu1 %v1078_v10 }
 0x32b   :  { %v510_v53 = vpop.permute.xlu1 %509 }
 0x32c   :  { %v539_v54 = vmul.f32 %v849_v52, %v510_v53 }
 0x32e   :  { %v557_v56 = vrot.slane %v539_v54, 4 }
 0x330   :  { %v558_v40 = vadd.f32 %v557_v56, %v539_v54  ;;  %v500_v58 = vpop.permute.xlu1 %499 }
 0x331   :  { %v537_v59 = vmul.f32 %v847_v57, %v500_v58  ;;  %v505_v61 = vpop.permute.xlu0 %504 }
 0x332   :  { %v559_v44 = vrot.slane %v558_v40, 2  ;;  %v538_v20 = vmul.f32 %v848_v60, %v505_v61 }
 0x333   :  { %v545_v63 = vrot.slane %v537_v59, 4 }
 0x334   :  { %v560_v0 = vadd.f32 %v559_v44, %v558_v40  ;;  %v551_v1 = vrot.slane %v538_v20, 4  ;;  %v515_v21 = vpop.permute.xlu1 %514 }
 0x335   :  { %v546_v3 = vadd.f32 %v545_v63, %v537_v59  ;;  %v540_v4 = vmul.f32 %v850_v49, %v515_v21 }
 0x336   :  { %v561_v5 = vrot.slane %v560_v0, 1  ;;  %v552_v7 = vadd.f32 %v551_v1, %v538_v20 }
 0x337   :  { %v547_v55 = vrot.slane %v546_v3, 2  ;;  %v563_v9 = vrot.slane %v540_v4, 4  ;;  %v520_v11 = vpop.permute.xlu0 %519 }
 0x338   :  { %v562_v23 = vadd.f32 %v561_v5, %v560_v0  ;;  %v553_v13 = vrot.slane %v552_v7, 2  ;;  %v541_v14 = vmul.f32 %v851_v24, %v520_v11  ;;  %v525_v15 = vpop.permute.xlu1 %524 }
 0x339   :  { %v548_v18 = vadd.f32 %v547_v55, %v546_v3  ;;  %v564_v19 = vadd.f32 %v563_v9, %v540_v4  ;;  %v542_v25 = vmul.f32 %v852_v62, %v525_v15 }
 0x33a   :  { %v595_v16 = vpack.c.bf16 %v562_v23, %v562_v23  ;;  %v554_v26 = vadd.f32 %v553_v13, %v552_v7  ;;  %v569_v30 = vrot.slane %v541_v14, 4 }
 0x33b   :  { %v549_v31 = vrot.slane %v548_v18, 1  ;;  %v565_v32 = vrot.slane %v564_v19, 2  ;;  %v575_v33 = vrot.slane %v542_v25, 4  ;;  %v530_v36 = vpop.permute.xlu0 %529 }
 0x33c   :  { %v603_v37 = vunpack.c.l.bf16 %v595_v16  ;;  %v555_v29 = vrot.slane %v554_v26, 1  ;;  %v570_v2 = vadd.f32 %v569_v30, %v541_v14  ;;  %v543_v43 = vmul.f32 %v853_v6, %v530_v36 }
 0x33d   :  { %v550_v38 = vadd.f32 %v549_v31, %v548_v18  ;;  %v566_v39 = vadd.f32 %v565_v32, %v564_v19  ;;  %v576_v42 = vadd.f32 %v575_v33, %v542_v25  ;;  %v535_v45 = vpop.permute.xlu1 %534  ;;  %v771_v56 = vunpack.c.l.b16 %v595_v16 }
 0x33e   :  { %v611_v22 = vsub.f32 %v562_v23, %v603_v37  ;;  %v556_v28 = vadd.f32 %v555_v29, %v554_v26  ;;  %v571_v12 = vrot.slane %v570_v2, 2  ;;  %v544_v17 = vmul.f32 %v854_v27, %v535_v45 }
 0x33f   :  { %v593_v34 = vpack.c.bf16 %v550_v38, %v550_v38  ;;  %v567_v52 = vrot.slane %v566_v39, 1  ;;  %v577_v53 = vrot.slane %v576_v42, 2  ;;  %v581_v54 = vrot.slane %v543_v43, 4 }
 0x340   :  { %v594_v40 = vpack.c.bf16 %v556_v28, %v556_v28  ;;  %v572_v57 = vadd.f32 %v571_v12, %v570_v2  ;;  %v587_v58 = vrot.slane %v544_v17, 4  ;;  %v619_v59 = vpack.c.bf16 %v611_v22, %v611_v22 }
 0x341   :  { %v601_v60 = vunpack.c.l.bf16 %v593_v34  ;;  %v568_v61 = vadd.f32 %v567_v52, %v566_v39  ;;  %v578_v44 = vadd.f32 %v577_v53, %v576_v42  ;;  %v769_v20 = vunpack.c.l.b16 %v593_v34 }
 0x342   :  { %v602_v63 = vunpack.c.l.bf16 %v594_v40  ;;  %v770_v0 = vunpack.c.l.b16 %v594_v40  ;;  %v573_v1 = vrot.slane %v572_v57, 1  ;;  %v582_v4 = vadd.f32 %v581_v54, %v543_v43 }
 0x343   :  { %v609_v49 = vsub.f32 %v550_v38, %v601_v60  ;;  %v596_v21 = vpack.c.bf16 %v568_v61, %v568_v61  ;;  %v579_v3 = vrot.slane %v578_v44, 1  ;;  %v588_v9 = vadd.f32 %v587_v58, %v544_v17 }
 0x344   :  { %v610_v5 = vsub.f32 %v556_v28, %v602_v63  ;;  %v777_v7 = vsel %vm657_vm15, %v770_v0, %v769_v20  ;;  %v574_v55 = vadd.f32 %v573_v1, %v572_v57  ;;  %v583_v6 = vrot.slane %v582_v4, 2 }
 0x345   :  { %v617_v24 = vpack.c.bf16 %v609_v49, %v609_v49  ;;  %v604_v11 = vunpack.c.l.bf16 %v596_v21  ;;  %v772_v62 = vunpack.c.l.b16 %v596_v21  ;;  %v778_v23 = vsel %vm659_vm0, %v771_v56, %v777_v7 }
 0x346   :  { %v618_v13 = vpack.c.bf16 %v610_v5, %v610_v5  ;;  %v597_v14 = vpack.c.bf16 %v574_v55, %v574_v55  ;;  %v580_v15 = vadd.f32 %v579_v3, %v578_v44  ;;  %v589_v27 = vrot.slane %v588_v9, 2 }
 0x347   :  { %v649_v18 = vunpack.c.l.b16 %v617_v24  ;;  %v612_v19 = vsub.f32 %v568_v61, %v604_v11  ;;  %v779_v25 = vsel %vm661_vm1, %v772_v62, %v778_v23  ;;  %v651_v32 = vunpack.c.l.b16 %v619_v59 }
 0x348   :  { %v650_v16 = vunpack.c.l.b16 %v618_v13  ;;  %v605_v26 = vunpack.c.l.bf16 %v597_v14  ;;  %v773_v30 = vunpack.c.l.b16 %v597_v14  ;;  %v598_v31 = vpack.c.bf16 %v580_v15, %v580_v15 }
 0x349   :  { %v620_v33 = vpack.c.bf16 %v612_v19, %v612_v19  ;;  %v584_v36 = vadd.f32 %v583_v6, %v582_v4  ;;  %v590_v37 = vadd.f32 %v589_v27, %v588_v9 }
 0x34a   :  { %v658_v29 = vsel %vm657_vm15, %v650_v16, %v649_v18  ;;  %v613_v2 = vsub.f32 %v574_v55, %v605_v26  ;;  %v606_v38 = vunpack.c.l.bf16 %v598_v31  ;;  %v774_v39 = vunpack.c.l.b16 %v598_v31 }
 0x34b   :  { %v652_v42 = vunpack.c.l.b16 %v620_v33  ;;  %v585_v43 = vrot.slane %v584_v36, 1  ;;  %v591_v45 = vrot.slane %v590_v37, 1  ;;  %v660_v22 = vsel %vm659_vm0, %v651_v32, %v658_v29 }
 0x34c   :  { %v621_v28 = vpack.c.bf16 %v613_v2, %v613_v2  ;;  %v614_v12 = vsub.f32 %v580_v15, %v606_v38  ;;  %v780_v17 = vsel %vm663_vm2, %v773_v30, %v779_v25 }
 0x34d   :  { %v586_v34 = vadd.f32 %v585_v43, %v584_v36  ;;  %v592_v52 = vadd.f32 %v591_v45, %v590_v37  ;;  %v662_v53 = vsel %vm661_vm1, %v652_v42, %v660_v22  ;;  %v781_v54 = vsel %vm665_vm3, %v774_v39, %v780_v17 }
 0x34e   :  { %v653_v56 = vunpack.c.l.b16 %v621_v28  ;;  %v622_v40 = vpack.c.bf16 %v614_v12, %v614_v12 }
 0x34f   :  { %v599_v57 = vpack.c.bf16 %v586_v34, %v586_v34  ;;  %v600_v58 = vpack.c.bf16 %v592_v52, %v592_v52 }
 0x350   :  { %v654_v59 = vunpack.c.l.b16 %v622_v40  ;;  %v664_v60 = vsel %vm663_vm2, %v653_v56, %v662_v53 }
 0x351   :  { %v607_v61 = vunpack.c.l.bf16 %v599_v57  ;;  %v775_v44 = vunpack.c.l.b16 %v599_v57  ;;  %v608_v20 = vunpack.c.l.bf16 %v600_v58  ;;  %v776_v63 = vunpack.c.l.b16 %v600_v58 }
 0x352   :  { %v666_v0 = vsel %vm665_vm3, %v654_v59, %v664_v60 }
 0x353   :  { %v615_v1 = vsub.f32 %v586_v34, %v607_v61  ;;  %v616_v49 = vsub.f32 %v592_v52, %v608_v20  ;;  %v782_v21 = vsel %vm667_vm4, %v775_v44, %v781_v54 }
 0x354   :  { %v783_v3 = vsel %vm669_vm5, %v776_v63, %v782_v21 }
 0x355   :  { %v623_v4 = vpack.c.bf16 %v615_v1, %v615_v1  ;;  %v624_v5 = vpack.c.bf16 %v616_v49, %v616_v49 }
 0x357   :  { %v655_v7 = vunpack.c.l.b16 %v623_v4  ;;  %v656_v55 = vunpack.c.l.b16 %v624_v5 }
 0x359   :  { %v668_v9 = vsel %vm667_vm4, %v655_v7, %v666_v0 }
 0x35a   :  { %v670_v24 = vsel %vm669_vm5, %v656_v55, %v668_v9 }
 0x35b   :  { %v671_v11 = vpack.c.b16 %v670_v24, %v670_v24 }
 0x35d   :  { %953 = vmatmul.mubr.bf16.vlgmr.msra.gmra.mrb[0].mxu1 %v671_v11 }
 0x35e   :  { %957 = vmatpush3.bf16.msra.mxu1 %v1286_v8  ;;  %972 = vmatprep.mubr.msk.bf16.mxu1 %vm1081_vm14, %v1078_v10  ;;  %v784_v8 = vpack.c.b16 %v783_v3, %v783_v3 }
 0x35f   :  { %958 = vmatprep.subr.bf16.mxu1 %v1078_v10 }
 0x362   :  { %959 = vmatpush3.bf16.msra.mxu1 %v1293_v35 }
 0x363   :  { %960 = vmatprep.subr.bf16.mxu1 %v1078_v10 }
 0x366   :  { %961 = vmatpush3.bf16.msra.mxu1 %v1300_v41 }
 0x367   :  { %962 = vmatprep.subr.bf16.mxu1 %v1078_v10 }
 0x36a   :  { %963 = vmatpush3.bf16.msra.mxu1 %v1307_v46 }
 0x36b   :  { %964 = vmatprep.subr.bf16.mxu1 %v1078_v10 }
 0x36e   :  { %965 = vmatpush3.bf16.msra.mxu1 %v1314_v47 }
 0x36f   :  { %966 = vmatprep.subr.bf16.mxu1 %v1078_v10 }
 0x372   :  { %967 = vmatpush3.bf16.msra.mxu1 %v1321_v48 }
 0x373   :  { %968 = vmatprep.subr.bf16.mxu1 %v1078_v10 }
 0x376   :  { %969 = vmatpush3.bf16.msra.mxu1 %v1328_v50 }
 0x377   :  { %970 = vmatprep.subr.bf16.mxu1 %v1078_v10 }
 0x37a   :  { %971 = vmatpush3.bf16.msra.mxu1 %v1335_v51 }
 0x37d   :  { %973 = vmatmul.mubr.bf16.vlgmr.msra.gmra.mrb[0].mxu1 %v784_v8 }
 0x450   :  { %v820_v35 = vpop.f32.mrb[0].mxu1 }
 0x451   :  { %827 = vrot.lane.b32.xlu0 %v820_v35, %s1082_s2  ;;  %v974_v41 = vpop.f32.mrb[1].mxu1 }
 0x452   :  { %v823_v46 = vpop.f32.mrb[2].mxu1 }
 0x453   :  { %v975_v47 = vpop.f32.mrb[3].mxu1 }
 0x4c3   :  { %v828_v62 = vpop.permute.xlu0 %827 }
 0x4c4   :  { %v830_v48 = vadd.f32 %v828_v62, %v820_v35 }
 0x4c6   :  { %832 = vst.msk [vmem:[#allocation3] sm:$0xff] %vm831_vm6, %v830_v48 }
 0x4c7   :  { %1064 = shalt.err (!%p1061_p4)
}
 0x4c8   :  { %s1065_s26 = scalar_lea.hbm %s1418_s6, 128 }
 0x4c9   :  { %p1066_p5 = scmp.ne.s32.totalorder %s1418_s6, %s1065_s26  ;;  %p1069_p6 = scmp.lt.u32.totalorder %s1065_s26, %s1418_s6 }
 0x4cb   :  { %p1071_p7 = pnand %p1069_p6, %p1066_p5 }
 0x4cd   :  { %1074 = shalt.err (!%p1071_p7)
}
 0x4ce   :  { %842 = dma.vmem_to_hbm [thread:$0]  %s840_s23, 128, %s1418_s6, [#allocation4]  }
 0x4cf   :  { %1075 = dma.done.wait [#allocation4], 128  }
 0x4d0   :  { %1076 = vsyncadd [#allocation4], 4294967168 }
 0x4d1   :  { %846 = vsyncpa [#allocation4], 1 }

</bundles_post_ra>
